<compile_context>
chip_gen: v7x
topology: tpu7x:2x2x1
jax: 0.10.0
libtpu: 0.0.40
codegen_flags: <defaults>
</compile_context>

<pallas_src>
import jax
import jax.numpy as jnp
from jax.experimental import pallas as pl
from jax.experimental.pallas import tpu as pltpu

# Linear(800, 316): 800 = src(316) + dest(316) + edge_attr(168)
SRC_DIM, DEST_DIM, EDGE_DIM = 316, 316, 168
IN_FEATURES = SRC_DIM + DEST_DIM + EDGE_DIM   # 800
OUT_FEATURES = 316

# Edge-tile size: 1024 rows keeps the double-buffered working set ~11 MiB,
# which fits the default scoped-VMEM limit on v5e (16 MiB), v6e (32 MiB) and
# v7x (32 MiB scoped / 64 MiB physical) without raising vmem_limit_bytes.
DEFAULT_TILE_E = 1024


def edge_mlp_kernel(src_ref, dest_ref, edge_ref,
                    w_src_ref, w_dst_ref, w_edge_ref, b_ref, o_ref):
    # Fused "concat + matmul": three dots against weight row-slices,
    # accumulated in f32, then bias + ReLU.
    acc = jnp.dot(src_ref[...], w_src_ref[...],
                  preferred_element_type=jnp.float32)
    acc = acc + jnp.dot(dest_ref[...], w_dst_ref[...],
                        preferred_element_type=jnp.float32)
    acc = acc + jnp.dot(edge_ref[...], w_edge_ref[...],
                        preferred_element_type=jnp.float32)
    acc = acc + b_ref[...]
    o_ref[...] = jnp.maximum(acc, 0.0).astype(o_ref.dtype)


def edge_model_3(src, dest, edge_attr, w, b, *, tile_e=DEFAULT_TILE_E):
    """ReLU(cat([src, dest, edge_attr], 1) @ w + b) via a tiled Pallas kernel."""
    E = src.shape[0]
    S, D, A = src.shape[1], dest.shape[1], edge_attr.shape[1]
    K = S + D + A
    N = w.shape[1]
    assert w.shape[0] == K

    src = src.astype(jnp.float32)
    dest = dest.astype(jnp.float32)
    edge_attr = edge_attr.astype(jnp.float32)
    w = w.astype(jnp.float32)

    # Row slices of the weight matrix, matching the (fused) concat layout.
    w_src = w[:S]
    w_dst = w[S:S + D]
    w_edge = w[S + D:]
    b2d = b.reshape(1, N).astype(jnp.float32)

    # Tile the edge dimension; clamp for tiny inputs (TE == E is a full-dim
    # block, so it is always layout-legal even if E is not a multiple of 8).
    te = tile_e if E >= tile_e else E
    grid = (pl.cdiv(E, te),)

    cost = pl.CostEstimate(
        flops=2 * E * K * N,
        transcendentals=0,
        bytes_accessed=4 * (E * K + K * N + N + E * N),
    )

    return pl.pallas_call(
        edge_mlp_kernel,
        out_shape=jax.ShapeDtypeStruct((E, N), jnp.float32),
        grid=grid,
        in_specs=[
            # Edge-tiled activations.
            pl.BlockSpec((te, S), lambda i: (i, 0)),
            pl.BlockSpec((te, D), lambda i: (i, 0)),
            pl.BlockSpec((te, A), lambda i: (i, 0)),
            # Weights / bias: block index never changes -> stay VMEM-resident.
            pl.BlockSpec((S, N), lambda i: (0, 0)),
            pl.BlockSpec((D, N), lambda i: (0, 0)),
            pl.BlockSpec((A, N), lambda i: (0, 0)),
            pl.BlockSpec((1, N), lambda i: (0, 0)),
        ],
        out_specs=pl.BlockSpec((te, N), lambda i: (i, 0)),
        compiler_params=pltpu.CompilerParams(
            # Edge tiles are independent -> megacore-shardable on v7x.
            dimension_semantics=("parallel",),
        ),
        cost_estimate=cost,
    )(src, dest, edge_attr, w_src, w_dst, w_edge, b2d)


if __name__ == "__main__":
    key = jax.random.PRNGKey(0)
    k_src, k_dst, k_edge, k_w, k_b = jax.random.split(key, 5)

    E = 8  # number of edges (small example)
    src = jax.random.normal(k_src, (E, SRC_DIM), dtype=jnp.float32)
    dest = jax.random.normal(k_dst, (E, DEST_DIM), dtype=jnp.float32)
    edge_attr = jax.random.normal(k_edge, (E, EDGE_DIM), dtype=jnp.float32)

    # Deterministic Linear(800, 316) params (PyTorch-style uniform init bound).
    bound = 1.0 / (IN_FEATURES ** 0.5)
    w = jax.random.uniform(k_w, (IN_FEATURES, OUT_FEATURES),
                           minval=-bound, maxval=bound, dtype=jnp.float32)
    b = jax.random.uniform(k_b, (OUT_FEATURES,),
                           minval=-bound, maxval=bound, dtype=jnp.float32)

    out = edge_model_3(src, dest, edge_attr, w, b)
    out = jax.block_until_ready(out)

    # Sanity check vs pure-JAX reference (force true-f32 matmul for the ref).
    x_cat = jnp.concatenate([src, dest, edge_attr], axis=1)
    ref = jnp.maximum(
        jnp.dot(x_cat, w, precision=jax.lax.Precision.HIGHEST) + b, 0.0)
    assert out.shape == (E, OUT_FEATURES)
    assert jnp.allclose(out, ref, atol=1e-4, rtol=1e-4)

    print("KERNEL_OK")
</pallas_src>

<mosaic_0001>
module attributes {stable_mosaic.version = 11 : i64} {
  func.func @edge_mlp_kernel(%arg0: i32, %arg1: memref<8x316xf32, #tpu.memory_space<vmem>>, %arg2: memref<8x316xf32, #tpu.memory_space<vmem>>, %arg3: memref<8x168xf32, #tpu.memory_space<vmem>>, %arg4: memref<316x316xf32, #tpu.memory_space<vmem>>, %arg5: memref<316x316xf32, #tpu.memory_space<vmem>>, %arg6: memref<168x316xf32, #tpu.memory_space<vmem>>, %arg7: memref<1x316xf32, #tpu.memory_space<vmem>>, %arg8: memref<8x316xf32, #tpu.memory_space<vmem>>) attributes {dimension_semantics = [#tpu.dimension_semantics<parallel>], iteration_bounds = array<i64: 1>, scalar_prefetch = 0 : i64, scratch_operands = 0 : i64, tpu.core_type = #tpu.core_type<tc>, window_params = [{transform_indices = @transform_0, window_bounds = array<i64: 8, 316>}, {transform_indices = @transform_1, window_bounds = array<i64: 8, 316>}, {transform_indices = @transform_2, window_bounds = array<i64: 8, 168>}, {pipeline_mode = #tpu.pipeline_mode<synchronous>, transform_indices = @transform_3, window_bounds = array<i64: 316, 316>}, {pipeline_mode = #tpu.pipeline_mode<synchronous>, transform_indices = @transform_4, window_bounds = array<i64: 316, 316>}, {pipeline_mode = #tpu.pipeline_mode<synchronous>, transform_indices = @transform_5, window_bounds = array<i64: 168, 316>}, {pipeline_mode = #tpu.pipeline_mode<synchronous>, transform_indices = @transform_6, window_bounds = array<i64: 1, 316>}, {transform_indices = @transform_7, window_bounds = array<i64: 8, 316>}]} {
    %c0 = arith.constant 0 : index
    %c0_0 = arith.constant 0 : index
    %0 = vector.load %arg1[%c0, %c0_0] : memref<8x316xf32, #tpu.memory_space<vmem>>, vector<8x316xf32>
    %c0_1 = arith.constant 0 : index
    %c0_2 = arith.constant 0 : index
    %1 = vector.load %arg4[%c0_1, %c0_2] : memref<316x316xf32, #tpu.memory_space<vmem>>, vector<316x316xf32>
    %cst = arith.constant dense<0.000000e+00> : vector<8x316xf32>
    %2 = tpu.matmul %0, %1, %cst {dimension_numbers = #tpu.dot_dimension_numbers<[1], [0], [0], [1], [0, 0, 1, 1], [], []>} : vector<8x316xf32>, vector<316x316xf32>, vector<8x316xf32> -> vector<8x316xf32>
    %c0_3 = arith.constant 0 : index
    %c0_4 = arith.constant 0 : index
    %3 = vector.load %arg2[%c0_3, %c0_4] : memref<8x316xf32, #tpu.memory_space<vmem>>, vector<8x316xf32>
    %c0_5 = arith.constant 0 : index
    %c0_6 = arith.constant 0 : index
    %4 = vector.load %arg5[%c0_5, %c0_6] : memref<316x316xf32, #tpu.memory_space<vmem>>, vector<316x316xf32>
    %cst_7 = arith.constant dense<0.000000e+00> : vector<8x316xf32>
    %5 = tpu.matmul %3, %4, %cst_7 {dimension_numbers = #tpu.dot_dimension_numbers<[1], [0], [0], [1], [0, 0, 1, 1], [], []>} : vector<8x316xf32>, vector<316x316xf32>, vector<8x316xf32> -> vector<8x316xf32>
    %6 = arith.addf %2, %5 : vector<8x316xf32>
    %c0_8 = arith.constant 0 : index
    %c0_9 = arith.constant 0 : index
    %7 = vector.load %arg3[%c0_8, %c0_9] : memref<8x168xf32, #tpu.memory_space<vmem>>, vector<8x168xf32>
    %c0_10 = arith.constant 0 : index
    %c0_11 = arith.constant 0 : index
    %8 = vector.load %arg6[%c0_10, %c0_11] : memref<168x316xf32, #tpu.memory_space<vmem>>, vector<168x316xf32>
    %cst_12 = arith.constant dense<0.000000e+00> : vector<8x316xf32>
    %9 = tpu.matmul %7, %8, %cst_12 {dimension_numbers = #tpu.dot_dimension_numbers<[1], [0], [0], [1], [0, 0, 1, 1], [], []>} : vector<8x168xf32>, vector<168x316xf32>, vector<8x316xf32> -> vector<8x316xf32>
    %10 = arith.addf %6, %9 : vector<8x316xf32>
    %c0_13 = arith.constant 0 : index
    %c0_14 = arith.constant 0 : index
    %11 = vector.load %arg7[%c0_13, %c0_14] : memref<1x316xf32, #tpu.memory_space<vmem>>, vector<1x316xf32>
    %12 = vector.broadcast %11 : vector<1x316xf32> to vector<8x316xf32>
    %13 = arith.addf %10, %12 : vector<8x316xf32>
    %cst_15 = arith.constant 0.000000e+00 : f32
    %14 = vector.broadcast %cst_15 : f32 to vector<8x316xf32>
    %15 = arith.maximumf %13, %14 : vector<8x316xf32>
    %c0_16 = arith.constant 0 : index
    %c0_17 = arith.constant 0 : index
    %16 = vector.load %arg8[%c0_16, %c0_17] : memref<8x316xf32, #tpu.memory_space<vmem>>, vector<8x316xf32>
    tpu.vector_store %arg8[%c0_16, %c0_17], %15 {strides = array<i32>} : memref<8x316xf32, #tpu.memory_space<vmem>>, vector<8x316xf32>,
    return
  }
  func.func @transform_0(%arg0: i32) -> (i32, i32) {
    %c0_i32 = arith.constant 0 : i32
    %c0_i32_0 = arith.constant 0 : i32
    return %arg0, %c0_i32 : i32, i32
  }
  func.func @transform_1(%arg0: i32) -> (i32, i32) {
    %c0_i32 = arith.constant 0 : i32
    %c0_i32_0 = arith.constant 0 : i32
    return %arg0, %c0_i32 : i32, i32
  }
  func.func @transform_2(%arg0: i32) -> (i32, i32) {
    %c0_i32 = arith.constant 0 : i32
    %c0_i32_0 = arith.constant 0 : i32
    return %arg0, %c0_i32 : i32, i32
  }
  func.func @transform_3(%arg0: i32) -> (i32, i32) {
    %c0_i32 = arith.constant 0 : i32
    %c0_i32_0 = arith.constant 0 : i32
    %c0_i32_1 = arith.constant 0 : i32
    return %c0_i32, %c0_i32_0 : i32, i32
  }
  func.func @transform_4(%arg0: i32) -> (i32, i32) {
    %c0_i32 = arith.constant 0 : i32
    %c0_i32_0 = arith.constant 0 : i32
    %c0_i32_1 = arith.constant 0 : i32
    return %c0_i32, %c0_i32_0 : i32, i32
  }
  func.func @transform_5(%arg0: i32) -> (i32, i32) {
    %c0_i32 = arith.constant 0 : i32
    %c0_i32_0 = arith.constant 0 : i32
    %c0_i32_1 = arith.constant 0 : i32
    return %c0_i32, %c0_i32_0 : i32, i32
  }
  func.func @transform_6(%arg0: i32) -> (i32, i32) {
    %c0_i32 = arith.constant 0 : i32
    %c0_i32_0 = arith.constant 0 : i32
    %c0_i32_1 = arith.constant 0 : i32
    return %c0_i32, %c0_i32_0 : i32, i32
  }
  func.func @transform_7(%arg0: i32) -> (i32, i32) {
    %c0_i32 = arith.constant 0 : i32
    %c0_i32_0 = arith.constant 0 : i32
    return %arg0, %c0_i32 : i32, i32
  }
}

</mosaic_0001>

<bundles_post_ra>
// kernel: tpu_custom_call.1
= control target key start
LH: loop header
LB: loop body
LE: loop exit
PB: predicated region body
PF: predicated region fallthrough
CT: control target
= control target key end

     0   :  { %12 = vsyncpa [#allocation3], 0  ;;  %s2082_s0 = inlined_call_operand.hbm [shape: f32[8,316], index: 0, kind: input, shape index: {}]   ;;  %s2083_s1 = inlined_call_operand.hbm [shape: f32[8,316], index: 1, kind: input, shape index: {}]   ;;  %s2084_s2 = inlined_call_operand.hbm [shape: f32[8,168], index: 2, kind: input, shape index: {}]   ;;  %s2085_s3 = inlined_call_operand.hbm [shape: f32[316,316], index: 3, kind: input, shape index: {}]   ;;  %s2086_s4 = inlined_call_operand.hbm [shape: f32[316,316], index: 4, kind: input, shape index: {}]   ;;  %s2087_s5 = inlined_call_operand.hbm [shape: f32[168,316], index: 5, kind: input, shape index: {}]   ;;  %s2088_s6 = inlined_call_operand.vmem [shape: f32[1,316], index: 6, kind: input, shape index: {}]   ;;  %s2089_s7 = inlined_call_operand.hbm [shape: f32[8,316], index: 7, kind: output, shape index: {}]  }
   0x1   :  { %13 = vsyncpa [#allocation6], 0 }
   0x2   :  { %14 = vsyncpa [#allocation9], 0 }
   0x3   :  { %15 = vsyncpa [#allocation12], 0 }
   0x4   :  { %16 = vsyncpa [#allocation4], 0  ;;  %s1843_s24 = smov [#allocation5]   ;;  %s1844_s26 = smov [#allocation8]  }
   0x5   :  { %s33_s25 = sshll.u32 %s1843_s24, 4  ;;  %s52_s27 = sshll.u32 %s1844_s26, 4  ;;  %s34_s25 = int_to_ptr.vmem [resolvable:$true] %s33_s25  ;;  %s1896_s27 = int_to_ptr.vmem [resolvable:$true] %s52_s27 }
   0x6   :  { %s1679_s30 = scalar_lea.hbm %s2083_s1, 384 }
   0x7   :  { %p1680_p0 = scmp.ne.s32.totalorder %s2083_s1, %s1679_s30  ;;  %p1683_p1 = scmp.lt.u32.totalorder %s1679_s30, %s2083_s1 }
   0x9   :  { %p1685_p2 = pnand %p1683_p1, %p1680_p0 }
   0xb   :  { %1688 = shalt.err (!%p1685_p2)
}
   0xc   :  { %s1689_s12 = scalar_lea.vmem %s34_s25, 384  ;;  %p1694_p4 = scmp.lt.s32.totalorder %s34_s25, %s34_s25 }
   0xd   :  { %p1690_p3 = scmp.ne.s32.totalorder %s34_s25, %s1689_s12  ;;  %p1695_p5 = scmp.lt.s32.totalorder %s1689_s12, %s1689_s12 }
   0xf   :  { %p1696_p6 = por %p1695_p5, %p1694_p4 }
  0x11   :  { %p1697_p7 = pnand %p1696_p6, %p1690_p3 }
  0x13   :  { %1700 = shalt.err (!%p1697_p7)
}
  0x14   :  { %36 = dma.hbm_to_vmem [thread:$0]  %s2083_s1, 384, %s34_s25, [#allocation6]  }
  0x15   :  { %s1701_s17 = scalar_lea.hbm %s2085_s3, 15360 }
  0x16   :  { %p1702_p8 = scmp.ne.s32.totalorder %s2085_s3, %s1701_s17  ;;  %p1705_p9 = scmp.lt.u32.totalorder %s1701_s17, %s2085_s3 }
  0x18   :  { %p1707_p10 = pnand %p1705_p9, %p1702_p8 }
  0x1a   :  { %1710 = shalt.err (!%p1707_p10)
}
  0x1b   :  { %s1711_s22 = scalar_lea.vmem %s1896_s27, 15360  ;;  %p1716_p12 = scmp.lt.s32.totalorder %s1896_s27, %s1896_s27 }
  0x1c   :  { %p1712_p11 = scmp.ne.s32.totalorder %s1896_s27, %s1711_s22  ;;  %p1717_p13 = scmp.lt.s32.totalorder %s1711_s22, %s1711_s22 }
  0x1e   :  { %p1718_p0 = por %p1717_p13, %p1716_p12 }
  0x20   :  { %p1719_p1 = pnand %p1718_p0, %p1712_p11 }
  0x22   :  { %1722 = shalt.err (!%p1719_p1)
}
  0x23   :  { %s1845_s1 = smov 384   ;;  %s1846_s23 = smov 24  }
  0x24   :  { %58 = dma.hbm_to_vmem [thread:$0]  %s2085_s3, 15360, %s1896_s27, [#allocation9], %s1845_s1, %s1845_s1, %s1846_s23  }
  0x25   :  { %s1847_s26 = smov [#allocation2]   ;;  %s1848_s29 = smov [#allocation7]  }
  0x26   :  { %s23_s28 = sshll.u32 %s1847_s26, 4  ;;  %s43_s30 = sshll.u32 %s1848_s29, 4  ;;  %s24_s28 = int_to_ptr.vmem [resolvable:$true] %s23_s28  ;;  %s44_s30 = int_to_ptr.vmem [resolvable:$true] %s43_s30 }
  0x27   :  { %s1723_s10 = scalar_lea.hbm %s2082_s0, 384 }
  0x28   :  { %p1724_p2 = scmp.ne.s32.totalorder %s2082_s0, %s1723_s10  ;;  %p1727_p3 = scmp.lt.u32.totalorder %s1723_s10, %s2082_s0 }
  0x2a   :  { %p1729_p4 = pnand %p1727_p3, %p1724_p2 }
  0x2c   :  { %1732 = shalt.err (!%p1729_p4)
}
  0x2d   :  { %s1733_s3 = scalar_lea.vmem %s24_s28, 384  ;;  %p1738_p6 = scmp.lt.s32.totalorder %s24_s28, %s24_s28 }
  0x2e   :  { %p1734_p5 = scmp.ne.s32.totalorder %s24_s28, %s1733_s3  ;;  %p1739_p7 = scmp.lt.s32.totalorder %s1733_s3, %s1733_s3 }
  0x30   :  { %p1740_p8 = por %p1739_p7, %p1738_p6 }
  0x32   :  { %p1741_p9 = pnand %p1740_p8, %p1734_p5 }
  0x34   :  { %1744 = shalt.err (!%p1741_p9)
}
  0x35   :  { %26 = dma.hbm_to_vmem [thread:$0]  %s2082_s0, 384, %s24_s28, [#allocation3]  }
  0x36   :  { %s1745_s18 = scalar_lea.hbm %s2084_s2, 256 }
  0x37   :  { %p1746_p10 = scmp.ne.s32.totalorder %s2084_s2, %s1745_s18  ;;  %p1749_p11 = scmp.lt.u32.totalorder %s1745_s18, %s2084_s2 }
  0x39   :  { %p1751_p12 = pnand %p1749_p11, %p1746_p10 }
  0x3b   :  { %1754 = shalt.err (!%p1751_p12)
}
  0x3c   :  { %s1755_s24 = scalar_lea.vmem %s44_s30, 256  ;;  %p1760_p0 = scmp.lt.s32.totalorder %s44_s30, %s44_s30 }
  0x3d   :  { %p1756_p13 = scmp.ne.s32.totalorder %s44_s30, %s1755_s24  ;;  %p1761_p1 = scmp.lt.s32.totalorder %s1755_s24, %s1755_s24 }
  0x3f   :  { %p1762_p2 = por %p1761_p1, %p1760_p0 }
  0x41   :  { %p1763_p3 = pnand %p1762_p2, %p1756_p13 }
  0x43   :  { %1766 = shalt.err (!%p1763_p3)
}
  0x44   :  { %46 = dma.hbm_to_vmem [thread:$0]  %s2084_s2, 256, %s44_s30, [#allocation6]  }
  0x45   :  { %s1849_s26 = smov [#allocation10]   ;;  %s1850_s29 = smov [#allocation11]  }
  0x46   :  { %s64_s28 = sshll.u32 %s1849_s26, 4  ;;  %s76_s8 = sshll.u32 %s1850_s29, 4  ;;  %s65_s28 = int_to_ptr.vmem [resolvable:$true] %s64_s28  ;;  %s1954_s8 = int_to_ptr.vmem [resolvable:$true] %s76_s8 }
  0x47   :  { %s1767_s11 = scalar_lea.hbm %s2086_s4, 15360 }
  0x48   :  { %p1768_p4 = scmp.ne.s32.totalorder %s2086_s4, %s1767_s11  ;;  %p1771_p5 = scmp.lt.u32.totalorder %s1767_s11, %s2086_s4 }
  0x4a   :  { %p1773_p6 = pnand %p1771_p5, %p1768_p4 }
  0x4c   :  { %1776 = shalt.err (!%p1773_p6)
}
  0x4d   :  { %s1777_s2 = scalar_lea.vmem %s65_s28, 15360  ;;  %p1782_p8 = scmp.lt.s32.totalorder %s65_s28, %s65_s28 }
  0x4e   :  { %p1778_p7 = scmp.ne.s32.totalorder %s65_s28, %s1777_s2  ;;  %p1783_p9 = scmp.lt.s32.totalorder %s1777_s2, %s1777_s2 }
  0x50   :  { %p1784_p10 = por %p1783_p9, %p1782_p8 }
  0x52   :  { %p1785_p11 = pnand %p1784_p10, %p1778_p7 }
  0x54   :  { %1788 = shalt.err (!%p1785_p11)
}
  0x55   :  { %70 = dma.hbm_to_vmem [thread:$0]  %s2086_s4, 15360, %s65_s28, [#allocation9], %s1845_s1, %s1845_s1, %s1846_s23  }
  0x56   :  { %s1789_s17 = scalar_lea.hbm %s2087_s5, 8064 }
  0x57   :  { %p1790_p12 = scmp.ne.s32.totalorder %s2087_s5, %s1789_s17  ;;  %p1793_p13 = scmp.lt.u32.totalorder %s1789_s17, %s2087_s5 }
  0x59   :  { %p1795_p0 = pnand %p1793_p13, %p1790_p12 }
  0x5b   :  { %1798 = shalt.err (!%p1795_p0)
}
  0x5c   :  { %s1799_s22 = scalar_lea.vmem %s1954_s8, 8064  ;;  %p1804_p2 = scmp.lt.s32.totalorder %s1954_s8, %s1954_s8 }
  0x5d   :  { %p1800_p1 = scmp.ne.s32.totalorder %s1954_s8, %s1799_s22  ;;  %p1805_p3 = scmp.lt.s32.totalorder %s1799_s22, %s1799_s22 }
  0x5f   :  { %p1806_p4 = por %p1805_p3, %p1804_p2 }
  0x61   :  { %p1807_p5 = pnand %p1806_p4, %p1800_p1 }
  0x63   :  { %1810 = shalt.err (!%p1807_p5)
}
  0x64   :  { %82 = dma.hbm_to_vmem [thread:$0]  %s2087_s5, 8064, %s1954_s8, [#allocation12], %s1845_s1, %s1845_s1, %s1846_s23  }
  0x65   :  { %1833 = dma.done.wait [#allocation3], 384  }
  0x66   :  { %1834 = vsyncadd [#allocation3], 4294966912 }
  0x67   :  { %1835 = dma.done.wait [#allocation6], 640  }
  0x68   :  { %1836 = vsyncadd [#allocation6], 4294966656 }
  0x69   :  { %1837 = dma.done.wait [#allocation9], 30720  }
  0x6a   :  { %1838 = vsyncadd [#allocation9], 4294936576 }
  0x6b   :  { %1839 = dma.done.wait [#allocation12], 8064  }
  0x6c   :  { %1840 = vsyncadd [#allocation12], 4294959232  ;;  %v230_v0 = vld [vmem:[#allocation10 + $0x8] sm:$0xff]  ;;  %v233_v1 = vld [vmem:[#allocation10 + $0x20] sm:$0xff]  ;;  %vm353_vm0 = vcmask 1043456   ;;  %vm1853_vm1 = vmmov 0  }
  0x6d   :  { %v279_v2 = vld [vmem:[#allocation10 + $0x190] sm:$0xff]  ;;  %v1334_v3 = vpack.c.bf16 %v233_v1, %v230_v0  ;;  %v282_v4 = vld [vmem:[#allocation10 + $0x1a8] sm:$0xff]  ;;  %v229_v5 = vld [vmem:[#allocation10] sm:$0xff]  ;;  %vm1854_vm2 = vmmov 1   ;;  %vm349_vm4 = vcmask 490496   ;;  %vm1004_vm5 = vcmask 326656  }
  0x6e   :  { %v232_v6 = vld [vmem:[#allocation10 + $0x18] sm:$0xff]  ;;  %v1416_v7 = vpack.c.bf16 %v282_v4, %v279_v2  ;;  %v231_v9 = vld [vmem:[#allocation10 + $0x10] sm:$0xff]  ;;  %v234_v10 = vld [vmem:[#allocation10 + $0x28] sm:$0xff]  ;;  %s1855_s23 = smov [#allocation13]  }
  0x6f   :  { %v1336_v8 = vpack.c.bf16 %v232_v6, %v229_v5  ;;  %v236_v11 = vld [vmem:[#allocation10 + $0x38] sm:$0xff]  ;;  %1335 = vmatprep.subr.bf16.mxu0 %v1334_v3  ;;  %v1418_v12 = vpack.c.bf16 %v234_v10, %v231_v9  ;;  %v239_v13 = vld [vmem:[#allocation10 + $0x50] sm:$0xff]  ;;  %v285_v14 = vld [vmem:[#allocation10 + $0x1c0] sm:$0xff]  ;;  %s1184_s0 = sshll.u32 %s1855_s23, 4  ;;  %s1185_s0 = int_to_ptr.vmem [resolvable:$true] %s1184_s0 }
  0x70   :  { %v288_v15 = vld [vmem:[#allocation10 + $0x1d8] sm:$0xff]  ;;  %1417 = vmatprep.subr.bf16.mxu1 %v1416_v7  ;;  %v1338_v16 = vpack.c.bf16 %v239_v13, %v236_v11  ;;  %v235_v18 = vld [vmem:[#allocation10 + $0x30] sm:$0xff]  ;;  %v238_v19 = vld [vmem:[#allocation10 + $0x48] sm:$0xff]  ;;  %p1816_p7 = scmp.lt.s32.totalorder %s1185_s0, %s1185_s0 }
  0x71   :  { %1337 = vmatpush1.bf16.msra.mxu0 %v1336_v8  ;;  %v1420_v17 = vpack.c.bf16 %v288_v15, %v285_v14  ;;  %v237_v20 = vld [vmem:[#allocation10 + $0x40] sm:$0xff]  ;;  %1419 = vmatpush3.bf16.msra.mxu1 %v1418_v12  ;;  %v1340_v21 = vpack.c.bf16 %v238_v19, %v235_v18  ;;  %v240_v22 = vld [vmem:[#allocation10 + $0x58] sm:$0xff]  ;;  %v242_v23 = vld [vmem:[#allocation10 + $0x68] sm:$0xff] }
  0x72   :  { %v245_v24 = vld [vmem:[#allocation10 + $0x80] sm:$0xff]  ;;  %1339 = vmatprep.subr.bf16.mxu0 %v1338_v16  ;;  %v1422_v25 = vpack.c.bf16 %v240_v22, %v237_v20  ;;  %v291_v27 = vld [vmem:[#allocation10 + $0x1f0] sm:$0xff]  ;;  %v294_v28 = vld [vmem:[#allocation10 + $0x208] sm:$0xff] }
  0x73   :  { %1421 = vmatprep.subr.bf16.mxu1 %v1420_v17  ;;  %v1342_v26 = vpack.c.bf16 %v245_v24, %v242_v23  ;;  %v241_v29 = vld [vmem:[#allocation10 + $0x60] sm:$0xff]  ;;  %v1424_v30 = vpack.c.bf16 %v294_v28, %v291_v27  ;;  %v244_v31 = vld [vmem:[#allocation10 + $0x78] sm:$0xff]  ;;  %v243_v32 = vld [vmem:[#allocation10 + $0x70] sm:$0xff] }
  0x74   :  { %v246_v33 = vld [vmem:[#allocation10 + $0x88] sm:$0xff]  ;;  %v1344_v34 = vpack.c.bf16 %v244_v31, %v241_v29  ;;  %v248_v35 = vld [vmem:[#allocation10 + $0x98] sm:$0xff]  ;;  %v251_v36 = vld [vmem:[#allocation10 + $0xb0] sm:$0xff] }
  0x75   :  { %1341 = vmatpush1.bf16.msra.mxu0 %v1340_v21  ;;  %v297_v37 = vld [vmem:[#allocation10 + $0x220] sm:$0xff]  ;;  %1423 = vmatpush3.bf16.msra.mxu1 %v1422_v25  ;;  %v1426_v38 = vpack.c.bf16 %v246_v33, %v243_v32  ;;  %v1346_v39 = vpack.c.bf16 %v251_v36, %v248_v35  ;;  %v300_v40 = vld [vmem:[#allocation10 + $0x238] sm:$0xff]  ;;  %v247_v41 = vld [vmem:[#allocation10 + $0x90] sm:$0xff] }
  0x76   :  { %1343 = vmatprep.subr.bf16.mxu0 %v1342_v26  ;;  %v250_v42 = vld [vmem:[#allocation10 + $0xa8] sm:$0xff]  ;;  %1425 = vmatprep.subr.bf16.mxu1 %v1424_v30  ;;  %v1428_v43 = vpack.c.bf16 %v300_v40, %v297_v37  ;;  %v249_v44 = vld [vmem:[#allocation10 + $0xa0] sm:$0xff]  ;;  %v252_v45 = vld [vmem:[#allocation10 + $0xb8] sm:$0xff] }
  0x77   :  { %v254_v46 = vld [vmem:[#allocation10 + $0xc8] sm:$0xff]  ;;  %v257_v47 = vld [vmem:[#allocation10 + $0xe0] sm:$0xff]  ;;  %v303_v48 = vld [vmem:[#allocation10 + $0x250] sm:$0xff]  ;;  %v1348_v50 = vpack.c.bf16 %v250_v42, %v247_v41  ;;  %v1430_v51 = vpack.c.bf16 %v252_v45, %v249_v44 }
  0x78   :  { %v306_v49 = vld [vmem:[#allocation10 + $0x268] sm:$0xff]  ;;  %v1350_v52 = vpack.c.bf16 %v257_v47, %v254_v46  ;;  %v253_v53 = vld [vmem:[#allocation10 + $0xc0] sm:$0xff]  ;;  %v256_v54 = vld [vmem:[#allocation10 + $0xd8] sm:$0xff] }
  0x79   :  { %1345 = vmatpush1.bf16.msra.mxu0 %v1344_v34  ;;  %1427 = vmatpush3.bf16.msra.mxu1 %v1426_v38  ;;  %v255_v55 = vld [vmem:[#allocation10 + $0xd0] sm:$0xff]  ;;  %v1432_v56 = vpack.c.bf16 %v306_v49, %v303_v48  ;;  %v258_v57 = vld [vmem:[#allocation10 + $0xe8] sm:$0xff]  ;;  %v260_v58 = vld [vmem:[#allocation10 + $0xf8] sm:$0xff]  ;;  %v1352_v62 = vpack.c.bf16 %v256_v54, %v253_v53 }
  0x7a   :  { %1347 = vmatprep.subr.bf16.mxu0 %v1346_v39  ;;  %1429 = vmatprep.subr.bf16.mxu1 %v1428_v43  ;;  %v263_v59 = vld [vmem:[#allocation10 + $0x110] sm:$0xff]  ;;  %v309_v60 = vld [vmem:[#allocation10 + $0x280] sm:$0xff]  ;;  %v312_v61 = vld [vmem:[#allocation10 + $0x298] sm:$0xff]  ;;  %v1434_v63 = vpack.c.bf16 %v258_v57, %v255_v55 }
  0x7b   :  { %v1354_v0 = vpack.c.bf16 %v263_v59, %v260_v58  ;;  %v259_v1 = vld [vmem:[#allocation10 + $0xf0] sm:$0xff]  ;;  %v262_v2 = vld [vmem:[#allocation10 + $0x108] sm:$0xff]  ;;  %v261_v3 = vld [vmem:[#allocation10 + $0x100] sm:$0xff]  ;;  %v1436_v4 = vpack.c.bf16 %v312_v61, %v309_v60 }
  0x7c   :  { %v264_v5 = vld [vmem:[#allocation10 + $0x118] sm:$0xff]  ;;  %v266_v6 = vld [vmem:[#allocation10 + $0x128] sm:$0xff]  ;;  %v269_v7 = vld [vmem:[#allocation10 + $0x140] sm:$0xff]  ;;  %v1356_v10 = vpack.c.bf16 %v262_v2, %v259_v1 }
  0x7d   :  { %1349 = vmatpush1.bf16.msra.mxu0 %v1348_v50  ;;  %1431 = vmatpush3.bf16.msra.mxu1 %v1430_v51  ;;  %v315_v8 = vld [vmem:[#allocation10 + $0x2b0] sm:$0xff]  ;;  %v318_v9 = vld [vmem:[#allocation10 + $0x2c8] sm:$0xff]  ;;  %v265_v11 = vld [vmem:[#allocation10 + $0x120] sm:$0xff]  ;;  %v1438_v12 = vpack.c.bf16 %v264_v5, %v261_v3  ;;  %v1358_v13 = vpack.c.bf16 %v269_v7, %v266_v6 }
  0x7e   :  { %1351 = vmatprep.subr.bf16.mxu0 %v1350_v52  ;;  %1433 = vmatprep.subr.bf16.mxu1 %v1432_v56  ;;  %v268_v14 = vld [vmem:[#allocation10 + $0x138] sm:$0xff]  ;;  %v267_v15 = vld [vmem:[#allocation10 + $0x130] sm:$0xff]  ;;  %v270_v16 = vld [vmem:[#allocation10 + $0x148] sm:$0xff]  ;;  %v1440_v17 = vpack.c.bf16 %v318_v9, %v315_v8 }
  0x7f   :  { %v272_v18 = vld [vmem:[#allocation10 + $0x158] sm:$0xff]  ;;  %v275_v19 = vld [vmem:[#allocation10 + $0x170] sm:$0xff]  ;;  %v227_v20 = vld [vmem:[#allocation5 + $0x8] sm:$0xff]  ;;  %v1360_v23 = vpack.c.bf16 %v268_v14, %v265_v11  ;;  %v1442_v24 = vpack.c.bf16 %v270_v16, %v267_v15 }
  0x80   :  { %v321_v21 = vld [vmem:[#allocation10 + $0x2e0] sm:$0xff]  ;;  %v324_v22 = vld [vmem:[#allocation10 + $0x2f8] sm:$0xff]  ;;  %569 = vmatprep.mubr.f32.mxu1 %v227_v20  ;;  %427 = vmatprep.mubr.f32.mxu0 %v227_v20  ;;  %v1362_v25 = vpack.c.bf16 %v275_v19, %v272_v18  ;;  %v271_v26 = vld [vmem:[#allocation10 + $0x150] sm:$0xff] }
  0x81   :  { %1353 = vmatpush1.bf16.msra.mxu0 %v1352_v62  ;;  %1435 = vmatpush3.bf16.msra.mxu1 %v1434_v63  ;;  %v274_v27 = vld [vmem:[#allocation10 + $0x168] sm:$0xff]  ;;  %v273_v28 = vld [vmem:[#allocation10 + $0x160] sm:$0xff]  ;;  %v1444_v29 = vpack.c.bf16 %v324_v22, %v321_v21  ;;  %v276_v30 = vld [vmem:[#allocation10 + $0x178] sm:$0xff] }
  0x82   :  { %1355 = vmatprep.subr.bf16.mxu0 %v1354_v0  ;;  %1437 = vmatprep.subr.bf16.mxu1 %v1436_v4  ;;  %v278_v31 = vld [vmem:[#allocation10 + $0x188] sm:$0xff]  ;;  %v281_v32 = vld [vmem:[#allocation10 + $0x1a0] sm:$0xff]  ;;  %v156_v33 = vld [vmem:[#allocation8 + $0x190] sm:$0xff]  ;;  %v1364_v35 = vpack.c.bf16 %v274_v27, %v271_v26  ;;  %v1446_v36 = vpack.c.bf16 %v276_v30, %v273_v28 }
  0x83   :  { %v159_v34 = vld [vmem:[#allocation8 + $0x1a8] sm:$0xff]  ;;  %v1366_v37 = vpack.c.bf16 %v281_v32, %v278_v31  ;;  %v277_v38 = vld [vmem:[#allocation10 + $0x180] sm:$0xff]  ;;  %v280_v39 = vld [vmem:[#allocation10 + $0x198] sm:$0xff] }
  0x84   :  { %v108_v40 = vld [vmem:[#allocation8 + $0x10] sm:$0xff]  ;;  %v1543_v41 = vpack.c.bf16 %v159_v34, %v156_v33  ;;  %v111_v42 = vld [vmem:[#allocation8 + $0x28] sm:$0xff]  ;;  %v284_v43 = vld [vmem:[#allocation10 + $0x1b8] sm:$0xff]  ;;  %v1368_v47 = vpack.c.bf16 %v280_v39, %v277_v38 }
  0x85   :  { %1357 = vmatpush1.bf16.msra.mxu0 %v1356_v10  ;;  %1439 = vmatpush3.bf16.msra.mxu1 %v1438_v12  ;;  %v287_v44 = vld [vmem:[#allocation10 + $0x1d0] sm:$0xff]  ;;  %v162_v45 = vld [vmem:[#allocation8 + $0x1c0] sm:$0xff]  ;;  %v165_v46 = vld [vmem:[#allocation8 + $0x1d8] sm:$0xff]  ;;  %v1545_v49 = vpack.c.bf16 %v111_v42, %v108_v40 }
  0x86   :  { %1359 = vmatprep.subr.bf16.mxu0 %v1358_v13  ;;  %1441 = vmatprep.subr.bf16.mxu1 %v1440_v17  ;;  %v1991_v48 = vld [vmem:[#allocation5] sm:$0xff]  ;;  %v1370_v50 = vpack.c.bf16 %v287_v44, %v284_v43  ;;  %v283_v51 = vld [vmem:[#allocation10 + $0x1b0] sm:$0xff]  ;;  %v286_v52 = vld [vmem:[#allocation10 + $0x1c8] sm:$0xff]  ;;  %v1547_v54 = vpack.c.bf16 %v165_v46, %v162_v45 }
  0x87   :  { %v114_v53 = vld [vmem:[#allocation8 + $0x40] sm:$0xff]  ;;  %v117_v55 = vld [vmem:[#allocation8 + $0x58] sm:$0xff]  ;;  %v290_v56 = vld [vmem:[#allocation10 + $0x1e8] sm:$0xff]  ;;  %v1372_v60 = vpack.c.bf16 %v286_v52, %v283_v51 }
  0x88   :  { %v293_v57 = vld [vmem:[#allocation10 + $0x200] sm:$0xff]  ;;  %v168_v58 = vld [vmem:[#allocation8 + $0x1f0] sm:$0xff]  ;;  %v171_v59 = vld [vmem:[#allocation8 + $0x208] sm:$0xff]  ;;  %v1549_v61 = vpack.c.bf16 %v117_v55, %v114_v53 }
  0x89   :  { %1361 = vmatpush1.bf16.msra.mxu0 %v1360_v23  ;;  %1443 = vmatpush3.bf16.msra.mxu1 %v1442_v24  ;;  %v1374_v62 = vpack.c.bf16 %v293_v57, %v290_v56  ;;  %v289_v63 = vld [vmem:[#allocation10 + $0x1e0] sm:$0xff]  ;;  %v292_v0 = vld [vmem:[#allocation10 + $0x1f8] sm:$0xff]  ;;  %v120_v1 = vld [vmem:[#allocation8 + $0x70] sm:$0xff]  ;;  %v1551_v2 = vpack.c.bf16 %v171_v59, %v168_v58 }
  0x8a   :  { %1363 = vmatprep.subr.bf16.mxu0 %v1362_v25  ;;  %1445 = vmatprep.subr.bf16.mxu1 %v1444_v29  ;;  %v123_v3 = vld [vmem:[#allocation8 + $0x88] sm:$0xff]  ;;  %v296_v4 = vld [vmem:[#allocation10 + $0x218] sm:$0xff]  ;;  %v299_v5 = vld [vmem:[#allocation10 + $0x230] sm:$0xff]  ;;  %v1376_v8 = vpack.c.bf16 %v292_v0, %v289_v63 }
  0x8b   :  { %v174_v6 = vld [vmem:[#allocation8 + $0x220] sm:$0xff]  ;;  %v177_v7 = vld [vmem:[#allocation8 + $0x238] sm:$0xff]  ;;  %v1553_v9 = vpack.c.bf16 %v123_v3, %v120_v1  ;;  %v1378_v10 = vpack.c.bf16 %v299_v5, %v296_v4  ;;  %v295_v11 = vld [vmem:[#allocation10 + $0x210] sm:$0xff] }
  0x8c   :  { %v298_v12 = vld [vmem:[#allocation10 + $0x228] sm:$0xff]  ;;  %v126_v13 = vld [vmem:[#allocation8 + $0xa0] sm:$0xff]  ;;  %v1555_v14 = vpack.c.bf16 %v177_v7, %v174_v6  ;;  %v129_v15 = vld [vmem:[#allocation8 + $0xb8] sm:$0xff] }
  0x8d   :  { %1365 = vmatpush1.bf16.msra.mxu0 %v1364_v35  ;;  %1447 = vmatpush3.bf16.msra.mxu1 %v1446_v36  ;;  %v302_v16 = vld [vmem:[#allocation10 + $0x248] sm:$0xff]  ;;  %v305_v17 = vld [vmem:[#allocation10 + $0x260] sm:$0xff]  ;;  %v180_v18 = vld [vmem:[#allocation8 + $0x250] sm:$0xff]  ;;  %v1380_v20 = vpack.c.bf16 %v298_v12, %v295_v11  ;;  %v1557_v22 = vpack.c.bf16 %v129_v15, %v126_v13 }
  0x8e   :  { %1367 = vmatprep.subr.bf16.mxu0 %v1366_v37  ;;  %1544 = vmatprep.subr.bf16.mxu1 %v1543_v41  ;;  %v183_v19 = vld [vmem:[#allocation8 + $0x268] sm:$0xff]  ;;  %v1382_v23 = vpack.c.bf16 %v305_v17, %v302_v16  ;;  %v301_v24 = vld [vmem:[#allocation10 + $0x240] sm:$0xff]  ;;  %v304_v25 = vld [vmem:[#allocation10 + $0x258] sm:$0xff] }
  0x8f   :  { %v1994_v21 = vld [vmem:[#allocation2 + $0x8] sm:$0xff]  ;;  %v132_v26 = vld [vmem:[#allocation8 + $0xd0] sm:$0xff]  ;;  %v1559_v27 = vpack.c.bf16 %v183_v19, %v180_v18  ;;  %v308_v29 = vld [vmem:[#allocation10 + $0x278] sm:$0xff]  ;;  %v1384_v33 = vpack.c.bf16 %v304_v25, %v301_v24 }
  0x90   :  { %570 = vmatmul.mubr.f32.vlgmr.msra.gmra.mrb[0].mxu1 %v1991_v48  ;;  %v135_v28 = vld [vmem:[#allocation8 + $0xe8] sm:$0xff]  ;;  %v311_v30 = vld [vmem:[#allocation10 + $0x290] sm:$0xff]  ;;  %v186_v31 = vld [vmem:[#allocation8 + $0x280] sm:$0xff] }
  0x91   :  { %1369 = vmatpush1.bf16.msra.mxu0 %v1368_v47  ;;  %1546 = vmatpush3.bf16.msra.mxu1 %v1545_v49  ;;  %v189_v32 = vld [vmem:[#allocation8 + $0x298] sm:$0xff]  ;;  %v1561_v34 = vpack.c.bf16 %v135_v28, %v132_v26  ;;  %v1386_v35 = vpack.c.bf16 %v311_v30, %v308_v29  ;;  %v307_v36 = vld [vmem:[#allocation10 + $0x270] sm:$0xff]  ;;  %v310_v37 = vld [vmem:[#allocation10 + $0x288] sm:$0xff] }
  0x92   :  { %1371 = vmatprep.subr.bf16.mxu0 %v1370_v50  ;;  %1548 = vmatprep.subr.bf16.mxu1 %v1547_v54  ;;  %v138_v38 = vld [vmem:[#allocation8 + $0x100] sm:$0xff]  ;;  %v1563_v39 = vpack.c.bf16 %v189_v32, %v186_v31  ;;  %v141_v40 = vld [vmem:[#allocation8 + $0x118] sm:$0xff]  ;;  %v314_v41 = vld [vmem:[#allocation10 + $0x2a8] sm:$0xff]  ;;  %v1388_v45 = vpack.c.bf16 %v310_v37, %v307_v36 }
  0x93   :  { %863 = vmatprep.mubr.f32.mxu1 %v1994_v21  ;;  %v317_v42 = vld [vmem:[#allocation10 + $0x2c0] sm:$0xff]  ;;  %v192_v43 = vld [vmem:[#allocation8 + $0x2b0] sm:$0xff]  ;;  %v195_v44 = vld [vmem:[#allocation8 + $0x2c8] sm:$0xff]  ;;  %v1565_v46 = vpack.c.bf16 %v141_v40, %v138_v38 }
  0x94   :  { %v1390_v47 = vpack.c.bf16 %v317_v42, %v314_v41  ;;  %v313_v49 = vld [vmem:[#allocation10 + $0x2a0] sm:$0xff]  ;;  %v316_v50 = vld [vmem:[#allocation10 + $0x2b8] sm:$0xff]  ;;  %v144_v51 = vld [vmem:[#allocation8 + $0x130] sm:$0xff]  ;;  %v1567_v52 = vpack.c.bf16 %v195_v44, %v192_v43 }
  0x95   :  { %1373 = vmatpush1.bf16.msra.mxu0 %v1372_v60  ;;  %1550 = vmatpush3.bf16.msra.mxu1 %v1549_v61  ;;  %v147_v53 = vld [vmem:[#allocation8 + $0x148] sm:$0xff]  ;;  %v320_v54 = vld [vmem:[#allocation10 + $0x2d8] sm:$0xff]  ;;  %v323_v55 = vld [vmem:[#allocation10 + $0x2f0] sm:$0xff]  ;;  %v1392_v58 = vpack.c.bf16 %v316_v50, %v313_v49 }
  0x96   :  { %1375 = vmatprep.subr.bf16.mxu0 %v1374_v62  ;;  %1552 = vmatprep.subr.bf16.mxu1 %v1551_v2  ;;  %v198_v56 = vld [vmem:[#allocation8 + $0x2e0] sm:$0xff]  ;;  %v201_v57 = vld [vmem:[#allocation8 + $0x2f8] sm:$0xff]  ;;  %v1569_v59 = vpack.c.bf16 %v147_v53, %v144_v51  ;;  %v1394_v60 = vpack.c.bf16 %v323_v55, %v320_v54  ;;  %v319_v61 = vld [vmem:[#allocation10 + $0x2d0] sm:$0xff] }
  0x97   :  { %v322_v62 = vld [vmem:[#allocation10 + $0x2e8] sm:$0xff]  ;;  %v150_v63 = vld [vmem:[#allocation8 + $0x160] sm:$0xff]  ;;  %v1571_v0 = vpack.c.bf16 %v201_v57, %v198_v56  ;;  %v153_v1 = vld [vmem:[#allocation8 + $0x178] sm:$0xff] }
  0x98   :  { %v326_v2 = vld [vmem:[#allocation10 + $0x308] sm:$0xff]  ;;  %v329_v3 = vld [vmem:[#allocation10 + $0x320] sm:$0xff]  ;;  %v1396_v4 = vpack.c.bf16 %v322_v62, %v319_v61  ;;  %v1573_v5 = vpack.c.bf16 %v153_v1, %v150_v63  ;;  %v332_v11 = vld [vmem:[#allocation10 + $0x338] sm:$0xff] }
  0x99   :  { %1377 = vmatpush1.bf16.msra.mxu0 %v1376_v8  ;;  %1554 = vmatpush3.bf16.msra.mxu1 %v1553_v9  ;;  %v1398_v6 = vpack.c.bf16 %v329_v3, %v326_v2  ;;  %v325_v7 = vld [vmem:[#allocation10 + $0x300] sm:$0xff]  ;;  %v328_v8 = vld [vmem:[#allocation10 + $0x318] sm:$0xff]  ;;  %v204_v9 = vld [vmem:[#allocation8 + $0x310] sm:$0xff] }
  0x9a   :  { %1379 = vmatprep.subr.bf16.mxu0 %v1378_v10  ;;  %1556 = vmatprep.subr.bf16.mxu1 %v1555_v14  ;;  %v207_v10 = vld [vmem:[#allocation8 + $0x328] sm:$0xff]  ;;  %v335_v12 = vld [vmem:[#allocation10 + $0x350] sm:$0xff]  ;;  %v1400_v13 = vpack.c.bf16 %v328_v8, %v325_v7  ;;  %v1997_v14 = vld [vmem:[#allocation2] sm:$0xff] }
  0x9b   :  { %v1576_v15 = vpack.c.bf16 %v207_v10, %v204_v9  ;;  %v1402_v16 = vpack.c.bf16 %v335_v12, %v332_v11  ;;  %v331_v17 = vld [vmem:[#allocation10 + $0x330] sm:$0xff]  ;;  %v334_v18 = vld [vmem:[#allocation10 + $0x348] sm:$0xff]  ;;  %v210_v19 = vld [vmem:[#allocation8 + $0x340] sm:$0xff] }
  0x9c   :  { %v341_v24 = vld [vmem:[#allocation10 + $0x380] sm:$0xff]  ;;  %v1404_v25 = vpack.c.bf16 %v334_v18, %v331_v17  ;;  %v340_v29 = vld [vmem:[#allocation10 + $0x378] sm:$0xff]  ;;  %v216_v30 = vld [vmem:[#allocation8 + $0x370] sm:$0xff] }
  0x9d   :  { %1381 = vmatpush1.bf16.msra.mxu0 %v1380_v20  ;;  %1558 = vmatpush3.bf16.msra.mxu1 %v1557_v22  ;;  %v1851_v20 = vmov 0.0|0.0   ;;  %v213_v22 = vld [vmem:[#allocation8 + $0x358] sm:$0xff]  ;;  %v337_v28 = vld [vmem:[#allocation10 + $0x360] sm:$0xff]  ;;  %v219_v31 = vld [vmem:[#allocation8 + $0x388] sm:$0xff] }
  0x9e   :  { %1383 = vmatprep.subr.bf16.mxu0 %v1382_v23  ;;  %1560 = vmatprep.subr.bf16.mxu1 %v1559_v27  ;;  %v338_v23 = vld [vmem:[#allocation10 + $0x368] sm:$0xff]  ;;  %v1579_v26 = vpack.c.bf16 %v213_v22, %v210_v19  ;;  %v344_v32 = vld [vmem:[#allocation10 + $0x398] sm:$0xff]  ;;  %v343_v37 = vld [vmem:[#allocation10 + $0x390] sm:$0xff] }
  0x9f   :  { %v1406_v27 = vpack.c.bf16 %v341_v24, %v338_v23  ;;  %v346_v38 = vld [vmem:[#allocation10 + $0x3a8] sm:$0xf]  ;;  %vm2007_vm3 = vmpackc.low %vm353_vm0, %vm1854_vm2  ;;  %v222_v40 = vld [vmem:[#allocation8 + $0x3a0] sm:$0xff] }
  0xa0   :  { %v225_v41 = vld [vmem:[#allocation8 + $0x3b8] sm:$0xf]  ;;  %v942_v42 = vld [vmem:[#allocation11 + $0x8] sm:$0xff]  ;;  %v945_v43 = vld [vmem:[#allocation11 + $0x20] sm:$0xff]  ;;  %v1413_v44 = vpack.c.bf16 %v346_v38, %v343_v37 }
  0xa1   :  { %1385 = vmatpush1.bf16.msra.mxu0 %v1384_v33  ;;  %1562 = vmatpush3.bf16.msra.mxu1 %v1561_v34  ;;  %v347_v33 = vld [vmem:[#allocation10 + $0x3b0] sm:$0xf]  ;;  %v1852_v34 = vmov 0.0   ;;  %v1588_v49 = vpack.c.bf16 %v945_v43, %v942_v42  ;;  %v941_v50 = vld [vmem:[#allocation11] sm:$0xff]  ;;  %v944_v51 = vld [vmem:[#allocation11 + $0x18] sm:$0xff] }
  0xa2   :  { %1387 = vmatprep.subr.bf16.mxu0 %v1386_v35  ;;  %1564 = vmatprep.subr.bf16.mxu1 %v1563_v39  ;;  %v1582_v35 = vpack.c.bf16 %v219_v31, %v216_v30  ;;  %v1410_v36 = vpack.c.bf16 %v347_v33, %v344_v32  ;;  %v951_v53 = vld [vmem:[#allocation11 + $0x50] sm:$0xff]  ;;  %v2016_v54 = vld [vmem:[#allocation5 + $0x10] sm:$0xff]  ;;  %v1590_v57 = vpack.c.bf16 %v944_v51, %v941_v50  ;;  %v2027_v2 = vld [vmem:[#allocation7 + $0x8] sm:$0xff]  ;;  %v1154_v39 = vlaneseq }
  0xa3   :  { %v2021_v56 = vld [vmem:[#allocation2 + $0x10] sm:$0xff]  ;;  %v950_v62 = vld [vmem:[#allocation11 + $0x48] sm:$0xff]  ;;  %v953_v7 = vld [vmem:[#allocation11 + $0x60] sm:$0xff] }
  0xa4   :  { %v947_v61 = vld [vmem:[#allocation11 + $0x30] sm:$0xff]  ;;  %v954_v63 = vld [vmem:[#allocation11 + $0x68] sm:$0xff]  ;;  %v956_v8 = vld [vmem:[#allocation11 + $0x78] sm:$0xff] }
  0xa5   :  { %1389 = vmatpush1.bf16.msra.mxu0 %v1388_v45  ;;  %1566 = vmatpush3.bf16.msra.mxu1 %v1565_v46  ;;  %v1585_v45 = vpack.c.bf16 %v225_v41, %v222_v40  ;;  %v327_v46 = vld [vmem:[#allocation10 + $0x310] sm:$0xff]  ;;  %v1594_v3 = vpack.c.bf16 %v950_v62, %v947_v61  ;;  %v960_v9 = vld [vmem:[#allocation11 + $0x98] sm:$0xff]  ;;  %v1598_v12 = vpack.c.bf16 %v956_v8, %v953_v7  ;;  %v962_v18 = vld [vmem:[#allocation11 + $0xa8] sm:$0xff] }
  0xa6   :  { %1391 = vmatprep.subr.bf16.mxu0 %v1390_v47  ;;  %1568 = vmatprep.subr.bf16.mxu1 %v1567_v52  ;;  %v330_v47 = vld [vmem:[#allocation10 + $0x328] sm:$0xff]  ;;  %v948_v52 = vld [vmem:[#allocation11 + $0x38] sm:$0xff]  ;;  %v963_v10 = vld [vmem:[#allocation11 + $0xb0] sm:$0xff] }
  0xa7   :  { %v1449_v55 = vpack.c.bf16 %v330_v47, %v327_v46  ;;  %v1600_v17 = vpack.c.bf16 %v963_v10, %v960_v9  ;;  %v107_v19 = vld [vmem:[#allocation8 + $0x8] sm:$0xff]  ;;  %v110_v22 = vld [vmem:[#allocation8 + $0x20] sm:$0xff]  ;;  %v968_v32 = vld [vmem:[#allocation11 + $0xd8] sm:$0xff] }
  0xa8   :  { %v966_v23 = vld [vmem:[#allocation11 + $0xc8] sm:$0xff]  ;;  %v969_v24 = vld [vmem:[#allocation11 + $0xe0] sm:$0xff]  ;;  %v113_v33 = vld [vmem:[#allocation8 + $0x38] sm:$0xff] }
  0xa9   :  { %1393 = vmatpush1.bf16.msra.mxu0 %v1392_v58  ;;  %1570 = vmatpush3.bf16.msra.mxu1 %v1569_v59  ;;  %v333_v58 = vld [vmem:[#allocation10 + $0x340] sm:$0xff]  ;;  %v336_v59 = vld [vmem:[#allocation10 + $0x358] sm:$0xff]  ;;  %v1604_v31 = vpack.c.bf16 %v969_v24, %v966_v23  ;;  %v112_v41 = vld [vmem:[#allocation8 + $0x30] sm:$0xff] }
  0xaa   :  { %1395 = vmatprep.subr.bf16.mxu0 %v1394_v60  ;;  %1572 = vmatprep.subr.bf16.mxu1 %v1571_v0  ;;  %v1592_v60 = vpack.c.bf16 %v951_v53, %v948_v52  ;;  %v957_v0 = vld [vmem:[#allocation11 + $0x80] sm:$0xff]  ;;  %v1452_v1 = vpack.c.bf16 %v336_v59, %v333_v58  ;;  %v115_v42 = vld [vmem:[#allocation8 + $0x48] sm:$0xff]  ;;  %v971_v43 = vld [vmem:[#allocation11 + $0xf0] sm:$0xff] }
  0xab   :  { %v965_v30 = vld [vmem:[#allocation11 + $0xc0] sm:$0xff]  ;;  %v119_v46 = vld [vmem:[#allocation8 + $0x68] sm:$0xff]  ;;  %v1467_v51 = vpack.c.bf16 %v115_v42, %v112_v41  ;;  %v125_v61 = vld [vmem:[#allocation8 + $0x98] sm:$0xff] }
  0xac   :  { %v1606_v38 = vpack.c.bf16 %v968_v32, %v965_v30  ;;  %v122_v47 = vld [vmem:[#allocation8 + $0x80] sm:$0xff]  ;;  %v128_v62 = vld [vmem:[#allocation8 + $0xb0] sm:$0xff]  ;;  %v986_v7 = vld [vmem:[#allocation11 + $0x168] sm:$0xff] }
  0xad   :  { %1397 = vmatpush1.bf16.msra.mxu0 %v1396_v4  ;;  %1574 = vmatpush3.bf16.msra.mxu1 %v1573_v5  ;;  %v339_v4 = vld [vmem:[#allocation10 + $0x370] sm:$0xff]  ;;  %v342_v5 = vld [vmem:[#allocation10 + $0x388] sm:$0xff]  ;;  %v981_v50 = vld [vmem:[#allocation11 + $0x140] sm:$0xff]  ;;  %v1469_v53 = vpack.c.bf16 %v122_v47, %v119_v46 }
  0xae   :  { %1399 = vmatprep.subr.bf16.mxu0 %v1398_v6  ;;  %1575 = vmatprep.subr.bf16.mxu1 %v1851_v20  ;;  %v1596_v6 = vpack.c.bf16 %v957_v0, %v954_v63  ;;  %v1455_v11 = vpack.c.bf16 %v342_v5, %v339_v4  ;;  %v977_v58 = vld [vmem:[#allocation11 + $0x120] sm:$0xff]  ;;  %v984_v63 = vld [vmem:[#allocation11 + $0x158] sm:$0xff]  ;;  %v127_v4 = vld [vmem:[#allocation8 + $0xa8] sm:$0xff] }
  0xaf   :  { %v983_v5 = vld [vmem:[#allocation11 + $0x150] sm:$0xff]  ;;  %v131_v8 = vld [vmem:[#allocation8 + $0xc8] sm:$0xff]  ;;  %v134_v9 = vld [vmem:[#allocation8 + $0xe0] sm:$0xff] }
  0xb0   :  { %428 = vmatmul.mubr.f32.vlgmr.msra.gmra.mrb[0].mxu0 %v1991_v48  ;;  %864 = vmatmul.mubr.f32.vlgmr.msra.gmra.mrb[2].mxu1 %v1997_v14  ;;  %v1408_v48 = vpack.c.bf16 %v340_v29, %v337_v28  ;;  %v106_v28 = vld [vmem:[#allocation8] sm:$0xff]  ;;  %v109_v29 = vld [vmem:[#allocation8 + $0x18] sm:$0xff]  ;;  %v990_v10 = vld [vmem:[#allocation11 + $0x188] sm:$0xff] }
  0xb1   :  { %1401 = vmatpush1.bf16.msra.mxu0 %v1400_v13  ;;  %1577 = vmatpush3.bf16.msra.mxu1 %v1576_v15  ;;  %v345_v13 = vld [vmem:[#allocation10 + $0x3a0] sm:$0xff]  ;;  %v348_v15 = vld [vmem:[#allocation10 + $0x3b8] sm:$0xf]  ;;  %v1463_v37 = vpack.c.bf16 %v109_v29, %v106_v28  ;;  %v140_v24 = vld [vmem:[#allocation8 + $0x110] sm:$0xff] }
  0xb2   :  { %1403 = vmatprep.subr.bf16.mxu0 %v1402_v16  ;;  %1578 = vmatprep.subr.bf16.mxu1 %v1851_v20  ;;  %v959_v16 = vld [vmem:[#allocation11 + $0x90] sm:$0xff]  ;;  %v137_v23 = vld [vmem:[#allocation8 + $0xf8] sm:$0xff]  ;;  %v142_v41 = vld [vmem:[#allocation8 + $0x120] sm:$0xff] }
  0xb3   :  { %498 = vmatprep.mubr.f32.mxu0 %v1852_v34  ;;  %1331 = vmatprep.mubr.msk.f32.mxu1 %vm1853_vm1, %v1852_v34  ;;  %v1481_v29 = vpack.c.bf16 %v140_v24, %v137_v23  ;;  %v136_v30 = vld [vmem:[#allocation8 + $0xf0] sm:$0xff]  ;;  %v145_v42 = vld [vmem:[#allocation8 + $0x138] sm:$0xff] }
  0xb4   :  { %v995_v32 = vld [vmem:[#allocation11 + $0x1b0] sm:$0xff]  ;;  %v1487_v46 = vpack.c.bf16 %v145_v42, %v142_v41 }
  0xb5   :  { %1405 = vmatpush1.bf16.msra.mxu0 %v1404_v25  ;;  %1580 = vmatpush3.bf16.msra.mxu1 %v1579_v26  ;;  %v1458_v25 = vpack.c.bf16 %v348_v15, %v345_v13  ;;  %v1602_v26 = vpack.c.bf16 %v962_v18, %v959_v16  ;;  %v1618_v13 = vpack.c.bf16 %v986_v7, %v983_v5  ;;  %v130_v16 = vld [vmem:[#allocation8 + $0xc0] sm:$0xff]  ;;  %v943_v47 = vld [vmem:[#allocation11 + $0x10] sm:$0xff] }
  0xb6   :  { %1407 = vmatprep.subr.bf16.mxu0 %v1406_v27  ;;  %1581 = vmatprep.subr.bf16.mxu1 %v1851_v20  ;;  %v1461_v27 = vpack.c.bf16 %v110_v22, %v107_v19  ;;  %v1477_v15 = vpack.c.bf16 %v134_v9, %v131_v8  ;;  %v989_v18 = vld [vmem:[#allocation11 + $0x180] sm:$0xff]  ;;  %v992_v22 = vld [vmem:[#allocation11 + $0x198] sm:$0xff]  ;;  %v955_v5 = vld [vmem:[#allocation11 + $0x70] sm:$0xff] }
  0xb7   :  { %v1622_v28 = vpack.c.bf16 %v992_v22, %v989_v18  ;;  %v160_v8 = vld [vmem:[#allocation8 + $0x1b0] sm:$0xff]  ;;  %v163_v9 = vld [vmem:[#allocation8 + $0x1c8] sm:$0xff]  ;;  %v169_v18 = vld [vmem:[#allocation8 + $0x1f8] sm:$0xff] }
  0xb8   :  { %v176_v22 = vld [vmem:[#allocation8 + $0x230] sm:$0xff] }
  0xb9   :  { %1409 = vmatpush1.bf16.msra.mxu0 %v1408_v48  ;;  %1583 = vmatpush3.bf16.msra.mxu1 %v1582_v35  ;;  %v116_v48 = vld [vmem:[#allocation8 + $0x50] sm:$0xff]  ;;  %v972_v35 = vld [vmem:[#allocation11 + $0xf8] sm:$0xff] }
  0xba   :  { %1412 = vmatprep.subr.msk.bf16.mxu0 %vm2007_vm3, %v1410_v36  ;;  %1584 = vmatprep.subr.bf16.mxu1 %v1851_v20  ;;  %v975_v36 = vld [vmem:[#allocation11 + $0x110] sm:$0xff]  ;;  %v1465_v40 = vpack.c.bf16 %v116_v48, %v113_v33  ;;  %v998_v48 = vld [vmem:[#allocation11 + $0x1c8] sm:$0xff] }
  0xbb   :  { %v188_v41 = vld [vmem:[#allocation8 + $0x290] sm:$0xff] }
  0xbd   :  { %1415 = vmatpush1.bf16.msk.msra.mxu0 %vm2007_vm3, %v1413_v44  ;;  %1587 = vmatpush3.bf16.msk.msra.mxu1 %vm2007_vm3, %v1585_v45  ;;  %v1608_v44 = vpack.c.bf16 %v975_v36, %v972_v35  ;;  %v974_v45 = vld [vmem:[#allocation11 + $0x108] sm:$0xff]  ;;  %v146_v36 = vld [vmem:[#allocation8 + $0x140] sm:$0xff] }
  0xbe   :  { %1448 = vmatprep.subr.bf16.mxu0 %v1851_v20  ;;  %1589 = vmatprep.subr.bf16.mxu1 %v1588_v49  ;;  %v978_v49 = vld [vmem:[#allocation11 + $0x128] sm:$0xff]  ;;  %v1610_v52 = vpack.c.bf16 %v974_v45, %v971_v43  ;;  %v149_v43 = vld [vmem:[#allocation8 + $0x158] sm:$0xff] }
  0xbf   :  { %v1612_v59 = vpack.c.bf16 %v981_v50, %v978_v49  ;;  %v143_v35 = vld [vmem:[#allocation8 + $0x128] sm:$0xff] }
  0xc0   :  { %1198 = vmatmul.mubr.msk.f32.vlgmr.msra.gmra.mrb[0].mxu0 %vm349_vm4, %v2016_v54  ;;  %1332 = vmatmul.mubr.msk.f32.vlgmr.msra.gmra.mrb[4].mxu1 %vm349_vm4, %v2021_v56  ;;  %v1002_v45 = vld [vmem:[#allocation11 + $0x1e8] sm:$0xff] }
  0xc1   :  { %1450 = vmatpush3.bf16.msra.mxu0 %v1449_v55  ;;  %1591 = vmatpush1.bf16.msra.mxu1 %v1590_v57  ;;  %v118_v55 = vld [vmem:[#allocation8 + $0x60] sm:$0xff]  ;;  %v121_v57 = vld [vmem:[#allocation8 + $0x78] sm:$0xff]  ;;  %v946_v49 = vld [vmem:[#allocation11 + $0x28] sm:$0xff] }
  0xc2   :  { %1451 = vmatprep.subr.bf16.mxu0 %v1851_v20  ;;  %1593 = vmatprep.subr.bf16.mxu1 %v1592_v60  ;;  %v980_v60 = vld [vmem:[#allocation11 + $0x138] sm:$0xff]  ;;  %v1471_v0 = vpack.c.bf16 %v121_v57, %v118_v55  ;;  %v155_v55 = vld [vmem:[#allocation8 + $0x188] sm:$0xff]  ;;  %v158_v57 = vld [vmem:[#allocation8 + $0x1a0] sm:$0xff] }
  0xc3   :  { %1312 = vmatprep.mubr.msk.f32.mxu0 %vm1853_vm1, %v1852_v34  ;;  %1206 = vmatprep.mubr.msk.f32.mxu1 %vm1004_vm5, %v2027_v2 }
  0xc5   :  { %1453 = vmatpush3.bf16.msra.mxu0 %v1452_v1  ;;  %1595 = vmatpush1.bf16.msra.mxu1 %v1594_v3  ;;  %v1614_v1 = vpack.c.bf16 %v980_v60, %v977_v58  ;;  %v124_v3 = vld [vmem:[#allocation8 + $0x90] sm:$0xff] }
  0xc6   :  { %1454 = vmatprep.subr.bf16.mxu0 %v1851_v20  ;;  %1597 = vmatprep.subr.bf16.mxu1 %v1596_v6  ;;  %v2041_v58 = vld [vmem:[#allocation7] sm:$0xff] }
  0xc9   :  { %1456 = vmatpush3.bf16.msra.mxu0 %v1455_v11  ;;  %1599 = vmatpush1.bf16.msra.mxu1 %v1598_v12  ;;  %v993_v11 = vld [vmem:[#allocation11 + $0x1a0] sm:$0xff]  ;;  %v1475_v12 = vpack.c.bf16 %v127_v4, %v124_v3 }
  0xca   :  { %1457 = vmatprep.subr.bf16.mxu0 %v1851_v20  ;;  %1601 = vmatprep.subr.bf16.mxu1 %v1600_v17  ;;  %v133_v17 = vld [vmem:[#allocation8 + $0xd8] sm:$0xff]  ;;  %v1620_v19 = vpack.c.bf16 %v993_v11, %v990_v10  ;;  %v167_v10 = vld [vmem:[#allocation8 + $0x1e8] sm:$0xff]  ;;  %v170_v11 = vld [vmem:[#allocation8 + $0x200] sm:$0xff] }
  0xcd   :  { %1460 = vmatpush3.bf16.msk.msra.mxu0 %vm2007_vm3, %v1458_v25  ;;  %1603 = vmatpush1.bf16.msra.mxu1 %v1602_v26  ;;  %v996_v25 = vld [vmem:[#allocation11 + $0x1b8] sm:$0xff]  ;;  %v999_v26 = vld [vmem:[#allocation11 + $0x1d0] sm:$0xff] }
  0xce   :  { %1462 = vmatprep.subr.bf16.mxu0 %v1461_v27  ;;  %1605 = vmatprep.subr.bf16.mxu1 %v1604_v31  ;;  %v1479_v27 = vpack.c.bf16 %v133_v17, %v130_v16  ;;  %v139_v31 = vld [vmem:[#allocation8 + $0x108] sm:$0xff]  ;;  %v1624_v33 = vpack.c.bf16 %v999_v26, %v996_v25  ;;  %v1501_v16 = vpack.c.bf16 %v170_v11, %v167_v10  ;;  %v166_v17 = vld [vmem:[#allocation8 + $0x1e0] sm:$0xff]  ;;  %v967_v25 = vld [vmem:[#allocation11 + $0xd0] sm:$0xff] }
  0xcf   :  { %v1503_v24 = vpack.c.bf16 %v169_v18, %v166_v17  ;;  %v970_v26 = vld [vmem:[#allocation11 + $0xe8] sm:$0xff]  ;;  %v997_v10 = vld [vmem:[#allocation11 + $0x1c0] sm:$0xff]  ;;  %v1000_v11 = vld [vmem:[#allocation11 + $0x1d8] sm:$0xff] }
  0xd0   :  { %1313 = vmatmul.mubr.msk.f32.vlgmr.msra.gmra.mrb[2].mxu0 %vm349_vm4, %v2016_v54  ;;  %v987_v54 = vld [vmem:[#allocation11 + $0x170] sm:$0xff]  ;;  %v1656_v17 = vpack.c.bf16 %v1000_v11, %v997_v10 }
  0xd1   :  { %1464 = vmatpush1.bf16.msra.mxu0 %v1463_v37  ;;  %721 = vmatprep.mubr.f32.mxu0 %v1994_v21  ;;  %v1473_v21 = vpack.c.bf16 %v128_v62, %v125_v61  ;;  %v1616_v6 = vpack.c.bf16 %v987_v54, %v984_v63  ;;  %v1483_v37 = vpack.c.bf16 %v139_v31, %v136_v30  ;;  %v949_v61 = vld [vmem:[#allocation11 + $0x40] sm:$0xff]  ;;  %v952_v62 = vld [vmem:[#allocation11 + $0x58] sm:$0xff]  ;;  %v179_v30 = vld [vmem:[#allocation8 + $0x248] sm:$0xff] }
  0xd2   :  { %1607 = vmatpush1.bf16.msra.mxu1 %v1606_v38  ;;  %1466 = vmatprep.subr.bf16.mxu0 %v1465_v40  ;;  %v1626_v38 = vpack.c.bf16 %v998_v48, %v995_v32  ;;  %v1485_v40 = vpack.c.bf16 %v146_v36, %v143_v35  ;;  %v1493_v63 = vpack.c.bf16 %v158_v57, %v155_v55  ;;  %v154_v54 = vld [vmem:[#allocation8 + $0x180] sm:$0xff]  ;;  %v976_v35 = vld [vmem:[#allocation11 + $0x118] sm:$0xff] }
  0xd3   :  { %1609 = vmatprep.subr.bf16.mxu1 %v1608_v44  ;;  %v152_v44 = vld [vmem:[#allocation8 + $0x170] sm:$0xff]  ;;  %v1632_v3 = vpack.c.bf16 %v952_v62, %v949_v61  ;;  %v182_v31 = vld [vmem:[#allocation8 + $0x260] sm:$0xff]  ;;  %v1641_v32 = vpack.c.bf16 %v970_v26, %v967_v25  ;;  %v988_v57 = vld [vmem:[#allocation11 + $0x178] sm:$0xff] }
  0xd4   :  { %v1489_v50 = vpack.c.bf16 %v152_v44, %v149_v43  ;;  %v973_v48 = vld [vmem:[#allocation11 + $0x100] sm:$0xff]  ;;  %v1509_v36 = vpack.c.bf16 %v182_v31, %v179_v30  ;;  %v979_v44 = vld [vmem:[#allocation11 + $0x130] sm:$0xff]  ;;  %v193_v61 = vld [vmem:[#allocation8 + $0x2b8] sm:$0xff] }
  0xd5   :  { %1468 = vmatpush1.bf16.msra.mxu0 %v1467_v51  ;;  %v148_v51 = vld [vmem:[#allocation8 + $0x150] sm:$0xff]  ;;  %v1644_v42 = vpack.c.bf16 %v976_v35, %v973_v48  ;;  %v985_v55 = vld [vmem:[#allocation11 + $0x160] sm:$0xff]  ;;  %v197_v62 = vld [vmem:[#allocation8 + $0x2d8] sm:$0xff] }
  0xd6   :  { %1611 = vmatpush1.bf16.msra.mxu1 %v1610_v52  ;;  %1470 = vmatprep.subr.bf16.mxu0 %v1469_v53  ;;  %v151_v52 = vld [vmem:[#allocation8 + $0x168] sm:$0xff]  ;;  %v1001_v53 = vld [vmem:[#allocation11 + $0x1e0] sm:$0xff]  ;;  %v1003_v26 = vld [vmem:[#allocation11 + $0x1f0] sm:$0xff] }
  0xd7   :  { %1613 = vmatprep.subr.bf16.mxu1 %v1612_v59  ;;  %v1629_v59 = vpack.c.bf16 %v946_v49, %v943_v47  ;;  %v1491_v60 = vpack.c.bf16 %v151_v52, %v148_v51  ;;  %v184_v47 = vld [vmem:[#allocation8 + $0x270] sm:$0xff]  ;;  %v187_v49 = vld [vmem:[#allocation8 + $0x288] sm:$0xff]  ;;  %v194_v51 = vld [vmem:[#allocation8 + $0x2c0] sm:$0xff] }
  0xd8   :  { %v218_v25 = vld [vmem:[#allocation8 + $0x380] sm:$0xff]  ;;  %v217_v30 = vld [vmem:[#allocation8 + $0x378] sm:$0xff]  ;;  %v224_v31 = vld [vmem:[#allocation8 + $0x3b0] sm:$0xf] }
  0xd9   :  { %1472 = vmatpush1.bf16.msra.mxu0 %v1471_v0  ;;  %v157_v0 = vld [vmem:[#allocation8 + $0x198] sm:$0xff]  ;;  %v223_v48 = vld [vmem:[#allocation8 + $0x3a8] sm:$0xf] }
  0xda   :  { %1615 = vmatpush1.bf16.msra.mxu1 %v1614_v1  ;;  %1474 = vmatprep.subr.bf16.mxu0 %v1473_v21  ;;  %v161_v1 = vld [vmem:[#allocation8 + $0x1b8] sm:$0xff]  ;;  %v164_v21 = vld [vmem:[#allocation8 + $0x1d0] sm:$0xff]  ;;  %v1495_v4 = vpack.c.bf16 %v157_v0, %v154_v54  ;;  %v1650_v54 = vpack.c.bf16 %v988_v57, %v985_v55 }
  0xdb   :  { %1617 = vmatprep.subr.bf16.mxu1 %v1616_v6  ;;  %v958_v6 = vld [vmem:[#allocation11 + $0x88] sm:$0xff]  ;;  %v1497_v7 = vpack.c.bf16 %v164_v21, %v161_v1  ;;  %v991_v1 = vld [vmem:[#allocation11 + $0x190] sm:$0xff] }
  0xdc   :  { %v994_v21 = vld [vmem:[#allocation11 + $0x1a8] sm:$0xff] }
  0xdd   :  { %1476 = vmatpush1.bf16.msra.mxu0 %v1475_v12  ;;  %v1635_v12 = vpack.c.bf16 %v958_v6, %v955_v5  ;;  %v199_v5 = vld [vmem:[#allocation8 + $0x2e8] sm:$0xff] }
  0xde   :  { %1619 = vmatpush1.bf16.msra.mxu1 %v1618_v13  ;;  %1478 = vmatprep.subr.bf16.mxu0 %v1477_v15  ;;  %v1499_v13 = vpack.c.bf16 %v163_v9, %v160_v8  ;;  %v961_v15 = vld [vmem:[#allocation11 + $0xa0] sm:$0xff]  ;;  %v203_v6 = vld [vmem:[#allocation8 + $0x308] sm:$0xff]  ;;  %v1653_v8 = vpack.c.bf16 %v994_v21, %v991_v1 }
  0xdf   :  { %1621 = vmatprep.subr.bf16.mxu1 %v1620_v19  ;;  %v173_v19 = vld [vmem:[#allocation8 + $0x218] sm:$0xff] }
  0xe1   :  { %1480 = vmatpush1.bf16.msra.mxu0 %v1479_v27  ;;  %v1505_v27 = vpack.c.bf16 %v176_v22, %v173_v19  ;;  %v208_v22 = vld [vmem:[#allocation8 + $0x330] sm:$0xff] }
  0xe2   :  { %1623 = vmatpush1.bf16.msra.mxu1 %v1622_v28  ;;  %1482 = vmatprep.subr.bf16.mxu0 %v1481_v29  ;;  %v172_v28 = vld [vmem:[#allocation8 + $0x210] sm:$0xff]  ;;  %v175_v29 = vld [vmem:[#allocation8 + $0x228] sm:$0xff] }
  0xe3   :  { %1625 = vmatprep.subr.bf16.mxu1 %v1624_v33  ;;  %v1507_v33 = vpack.c.bf16 %v175_v29, %v172_v28  ;;  %v214_v29 = vld [vmem:[#allocation8 + $0x360] sm:$0xff] }
  0xe5   :  { %1484 = vmatpush1.bf16.msra.mxu0 %v1483_v37  ;;  %v178_v37 = vld [vmem:[#allocation8 + $0x240] sm:$0xff] }
  0xe6   :  { %1627 = vmatpush1.bf16.msra.mxu1 %v1626_v38  ;;  %1486 = vmatprep.subr.bf16.mxu0 %v1485_v40  ;;  %v181_v38 = vld [vmem:[#allocation8 + $0x258] sm:$0xff] }
  0xe7   :  { %1048 = vmatprep.subr.mxu1 %v1002_v45  ;;  %v185_v40 = vld [vmem:[#allocation8 + $0x278] sm:$0xff]  ;;  %v1511_v43 = vpack.c.bf16 %v181_v38, %v178_v37  ;;  %v982_v45 = vld [vmem:[#allocation11 + $0x148] sm:$0xff] }
  0xe8   :  { %v1647_v52 = vpack.c.bf16 %v982_v45, %v979_v44 }
  0xe9   :  { %1488 = vmatpush1.bf16.msra.mxu0 %v1487_v46  ;;  %v1513_v46 = vpack.c.bf16 %v188_v41, %v185_v40 }
  0xea   :  { %1049 = vmatpush1.msra.mxu1 %v1001_v53  ;;  %1490 = vmatprep.subr.bf16.mxu0 %v1489_v50  ;;  %v191_v50 = vld [vmem:[#allocation8 + $0x2a8] sm:$0xff]  ;;  %v1515_v53 = vpack.c.bf16 %v187_v49, %v184_v47 }
  0xeb   :  { %1628 = vmatprep.subr.bf16.mxu1 %v1851_v20  ;;  %1073 = vmatmul.mubr.f32.vlgmr.msra.gmra.mrb[6].mxu1 %v2041_v58 }
  0xec   :  { %1630 = vmatpush1.bf16.msra.mxu1 %v1629_v59  ;;  %1207 = vmatprep.mubr.msk.f32.mxu1 %vm1004_vm5, %v2027_v2  ;;  %v964_v2 = vld [vmem:[#allocation11 + $0xb8] sm:$0xff]  ;;  %v1517_v59 = vpack.c.bf16 %v194_v51, %v191_v50  ;;  %v1155_v51 = vshrl.u32 %v1154_v39, 7 }
  0xed   :  { %1492 = vmatpush1.bf16.msra.mxu0 %v1491_v60  ;;  %1631 = vmatprep.subr.bf16.mxu1 %v1851_v20  ;;  %v1638_v23 = vpack.c.bf16 %v964_v2, %v961_v15  ;;  %v190_v60 = vld [vmem:[#allocation8 + $0x2a0] sm:$0xff]  ;;  %v205_v15 = vld [vmem:[#allocation8 + $0x318] sm:$0xff] }
  0xee   :  { %1494 = vmatprep.subr.bf16.mxu0 %v1493_v63  ;;  %v200_v63 = vld [vmem:[#allocation8 + $0x2f0] sm:$0xff]  ;;  %v1519_v0 = vpack.c.bf16 %v193_v61, %v190_v60  ;;  %v209_v2 = vld [vmem:[#allocation8 + $0x338] sm:$0xff] }
  0xf0   :  { %1633 = vmatpush1.bf16.msra.mxu1 %v1632_v3  ;;  %v1521_v3 = vpack.c.bf16 %v200_v63, %v197_v62  ;;  %v1156_v62 = vsub.s32 0, %v1155_v51  ;;  %v1160_v63 = vsub.s32 1, %v1155_v51 }
  0xf1   :  { %1496 = vmatpush1.bf16.msra.mxu0 %v1495_v4  ;;  %1634 = vmatprep.subr.bf16.mxu1 %v1851_v20  ;;  %v196_v4 = vld [vmem:[#allocation8 + $0x2d0] sm:$0xff] }
  0xf2   :  { %1498 = vmatprep.subr.bf16.mxu0 %v1497_v7  ;;  %v206_v7 = vld [vmem:[#allocation8 + $0x320] sm:$0xff]  ;;  %v1523_v9 = vpack.c.bf16 %v199_v5, %v196_v4 }
  0xf4   :  { %1636 = vmatpush1.bf16.msra.mxu1 %v1635_v12  ;;  %v1525_v12 = vpack.c.bf16 %v206_v7, %v203_v6 }
  0xf5   :  { %1500 = vmatpush1.bf16.msra.mxu0 %v1499_v13  ;;  %1637 = vmatprep.subr.bf16.mxu1 %v1851_v20  ;;  %v202_v13 = vld [vmem:[#allocation8 + $0x300] sm:$0xff] }
  0xf6   :  { %1502 = vmatprep.subr.bf16.mxu0 %v1501_v16  ;;  %v212_v16 = vld [vmem:[#allocation8 + $0x350] sm:$0xff]  ;;  %v1527_v18 = vpack.c.bf16 %v205_v15, %v202_v13 }
  0xf7   :  { %v1529_v19 = vpack.c.bf16 %v212_v16, %v209_v2 }
  0xf8   :  { %1639 = vmatpush1.bf16.msra.mxu1 %v1638_v23  ;;  %v211_v23 = vld [vmem:[#allocation8 + $0x348] sm:$0xff] }
  0xf9   :  { %1504 = vmatpush1.bf16.msra.mxu0 %v1503_v24  ;;  %1640 = vmatprep.subr.bf16.mxu1 %v1851_v20  ;;  %v215_v24 = vld [vmem:[#allocation8 + $0x368] sm:$0xff] }
  0xfa   :  { %1506 = vmatprep.subr.bf16.mxu0 %v1505_v27  ;;  %v1531_v27 = vpack.c.bf16 %v211_v23, %v208_v22  ;;  %v1533_v28 = vpack.c.bf16 %v218_v25, %v215_v24 }
  0xfc   :  { %1642 = vmatpush1.bf16.msra.mxu1 %v1641_v32  ;;  %v1535_v32 = vpack.c.bf16 %v217_v30, %v214_v29 }
  0xfd   :  { %1508 = vmatpush1.bf16.msra.mxu0 %v1507_v33  ;;  %1643 = vmatprep.subr.bf16.mxu1 %v1851_v20  ;;  %v220_v33 = vld [vmem:[#allocation8 + $0x390] sm:$0xff] }
  0xfe   :  { %1510 = vmatprep.subr.bf16.mxu0 %v1509_v36  ;;  %v1540_v35 = vpack.c.bf16 %v223_v48, %v220_v33 }
 0x100   :  { %1645 = vmatpush1.bf16.msra.mxu1 %v1644_v42 }
 0x101   :  { %1512 = vmatpush1.bf16.msra.mxu0 %v1511_v43  ;;  %1646 = vmatprep.subr.bf16.mxu1 %v1851_v20 }
 0x102   :  { %1514 = vmatprep.subr.bf16.mxu0 %v1513_v46 }
 0x104   :  { %1648 = vmatpush1.bf16.msra.mxu1 %v1647_v52  ;;  %v1164_v52 = vsub.s32 2, %v1155_v51 }
 0x105   :  { %1516 = vmatpush1.bf16.msra.mxu0 %v1515_v53  ;;  %1649 = vmatprep.subr.bf16.mxu1 %v1851_v20 }
 0x106   :  { %1518 = vmatprep.subr.bf16.mxu0 %v1517_v59 }
 0x108   :  { %1651 = vmatpush1.bf16.msra.mxu1 %v1650_v54 }
 0x109   :  { %1520 = vmatpush1.bf16.msra.mxu0 %v1519_v0  ;;  %1652 = vmatprep.subr.bf16.mxu1 %v1851_v20 }
 0x10a   :  { %1522 = vmatprep.subr.bf16.mxu0 %v1521_v3 }
 0x10c   :  { %1654 = vmatpush1.bf16.msra.mxu1 %v1653_v8 }
 0x10d   :  { %1524 = vmatpush1.bf16.msra.mxu0 %v1523_v9  ;;  %1655 = vmatprep.subr.bf16.mxu1 %v1851_v20  ;;  %v221_v20 = vld [vmem:[#allocation8 + $0x398] sm:$0xff] }
 0x10e   :  { %1526 = vmatprep.subr.bf16.mxu0 %v1525_v12 }
 0x110   :  { %1657 = vmatpush1.bf16.msra.mxu1 %v1656_v17  ;;  %722 = vmatmul.mubr.f32.vlgmr.msra.gmra.mrb[0].mxu0 %v1997_v14  ;;  %v1537_v14 = vpack.c.bf16 %v224_v31, %v221_v20 }
 0x111   :  { %1528 = vmatpush1.bf16.msra.mxu0 %v1527_v18  ;;  %1119 = vmatprep.subr.mxu1 %v1852_v34 }
 0x112   :  { %1530 = vmatprep.subr.bf16.mxu0 %v1529_v19  ;;  %792 = vmatprep.mubr.f32.mxu0 %v1852_v34 }
 0x114   :  { %1120 = vmatpush1.msra.mxu1 %v1003_v26 }
 0x115   :  { %1144 = vmatmul.mubr.f32.vlgmr.msra.gmra.mrb[8].mxu1 %v2041_v58  ;;  %1532 = vmatpush1.bf16.msra.mxu0 %v1531_v27 }
 0x116   :  { %1534 = vmatprep.subr.bf16.mxu0 %v1533_v28 }
 0x119   :  { %1536 = vmatpush1.bf16.msra.mxu0 %v1535_v32 }
 0x11a   :  { %1539 = vmatprep.subr.msk.bf16.mxu0 %vm2007_vm3, %v1537_v14 }
 0x11d   :  { %1542 = vmatpush1.bf16.msk.msra.mxu0 %vm2007_vm3, %v1540_v35 }
 0x120   :  { %1203 = vmatmul.mubr.msk.f32.vlgmr.msra.gmra.mrb[0].mxu0 %vm349_vm4, %v2021_v56  ;;  %v1152_v56 = vld [vmem:[%s2088_s6] sm:$0x7]  ;;  %s1811_s6 = scalar_lea.vmem %s1185_s0, 384 }
 0x121   :  { %v1165_v53 = vrot.slane %v1152_v56, %v1164_v52  ;;  %v1157_v54 = vrot.slane %v1152_v56, %v1156_v62  ;;  %v1161_v1 = vrot.slane %v1152_v56, %v1160_v63  ;;  %p1812_p6 = scmp.ne.s32.totalorder %s1185_s0, %s1811_s6  ;;  %p1817_p8 = scmp.lt.s32.totalorder %s1811_s6, %s1811_s6 }
 0x123   :  { %p1818_p9 = por %p1817_p8, %p1816_p7 }
 0x125   :  { %p1819_p10 = pnand %p1818_p9, %p1812_p6 }
 0x163   :  { %v1240_v34 = vpop.f32.mrb[0].mxu1 }
 0x164   :  { %v1241_v36 = vpop.f32.mrb[1].mxu1 }
 0x165   :  { %v1242_v58 = vadd.f32 %v1241_v36, %v1240_v34 }
 0x183   :  { %v1284_v37 = vpop.f32.mrb[2].mxu1 }
 0x184   :  { %v1285_v38 = vpop.f32.mrb[3].mxu1 }
 0x185   :  { %v1286_v40 = vadd.f32 %v1285_v38, %v1284_v37 }
 0x193   :  { %v935_v41 = vpop.f32.mrb[4].mxu1 }
 0x194   :  { %v1333_v42 = vpop.f32.mrb[5].mxu1 }
 0x1a3   :  { %v641_v43 = vpop.f32.mrb[2].mxu0 }
 0x1a4   :  { %v642_v44 = vadd.f32 %v1242_v58, %v641_v43  ;;  %v1314_v45 = vpop.f32.mrb[3].mxu0 }
 0x1a6   :  { %v866_v46 = vadd.f32 %v1286_v40, %v642_v44 }
 0x1a8   :  { %v936_v47 = vadd.f32 %v935_v41, %v866_v46 }
 0x1be   :  { %v1074_v49 = vpop.f32.mrb[6].mxu1 }
 0x1bf   :  { %v1076_v50 = vpop.f32.mrb[7].mxu1 }
 0x1e8   :  { %v1145_v55 = vpop.f32.mrb[8].mxu1 }
 0x1e9   :  { %v1151_v57 = vadd.f32 %v1145_v55, %v936_v47  ;;  %v1147_v59 = vpop.f32.mrb[9].mxu1 }
 0x1eb   :  { %v1171_v60 = vadd.f32 %v1165_v53, %v1151_v57 }
 0x1ed   :  { %v1174_v61 = vmax.f32 %v1171_v60, 0.0 }
 0x1ef   :  { %1177 = vst.msk [vmem:[#allocation13 + $0x10] sm:$0xff] %vm349_vm4, %v1174_v61 }
 0x1f3   :  { %v794_v0 = vpop.f32.mrb[0].mxu0 }
 0x1f4   :  { %v1658_v21 = vadd.f32 %v1074_v49, %v794_v0  ;;  %v796_v3 = vpop.f32.mrb[1].mxu0 }
 0x1f5   :  { %v1659_v4 = vadd.f32 %v1076_v50, %v796_v3 }
 0x1f6   :  { %v1169_v5 = vadd.f32 %v1658_v21, %v1157_v54 }
 0x1f7   :  { %v1170_v6 = vadd.f32 %v1659_v4, %v1161_v1 }
 0x1f8   :  { %v1172_v7 = vmax.f32 %v1169_v5, 0.0 }
 0x1f9   :  { %v1173_v8 = vmax.f32 %v1170_v6, 0.0 }
 0x1fa   :  { %1175 = vst [vmem:[#allocation13] sm:$0xff] %v1172_v7 }
 0x1fb   :  { %1176 = vst [vmem:[#allocation13 + $0x8] sm:$0xff] %v1173_v8 }
 0x1fc   :  { %1822 = shalt.err (!%p1819_p10)
}
 0x1fd   :  { %s1823_s28 = scalar_lea.hbm %s2089_s7, 384 }
 0x1fe   :  { %p1824_p11 = scmp.ne.s32.totalorder %s2089_s7, %s1823_s28  ;;  %p1827_p12 = scmp.lt.u32.totalorder %s1823_s28, %s2089_s7 }
 0x200   :  { %p1829_p13 = pnand %p1827_p12, %p1824_p11 }
 0x202   :  { %1832 = shalt.err (!%p1829_p13)
}
 0x203   :  { %1187 = dma.vmem_to_hbm [thread:$0]  %s1185_s0, 384, %s2089_s7, [#allocation4]  }
 0x204   :  { %1841 = dma.done.wait [#allocation4], 384  }
 0x205   :  { %1842 = vsyncadd [#allocation4], 4294966912 }
 0x206   :  { %1191 = vsyncpa [#allocation3], 1 }
 0x207   :  { %1192 = vsyncpa [#allocation6], 1 }
 0x208   :  { %1193 = vsyncpa [#allocation9], 1 }
 0x209   :  { %1194 = vsyncpa [#allocation12], 1 }
 0x20a   :  { %1195 = vsyncpa [#allocation4], 1 }

</bundles_post_ra>
